<compile_context>
chip_gen: v6e
topology: v6e:2x2x1
jax: 0.10.0
libtpu: 0.0.40
codegen_flags: <defaults>
</compile_context>

<pallas_src>
import math
import functools

import jax
import jax.numpy as jnp
from jax.experimental import pallas as pl
from jax.experimental.pallas import tpu as pltpu

_MIB = 1024 * 1024


# ---------------------------------------------------------------------------
# Kernels
# ---------------------------------------------------------------------------

def _pos_emb_packed_kernel(x_ref, w_ref, sel_ref, out_ref, *, groups):
    """Lane-dense form: `groups` original rows folded into the lane axis.

    x_ref:   (tn, g)       f32  g consecutive timesteps per packed row
    w_ref:   (g, g*dim)    f32  block-diagonal rows of scale*freqs (resident)
    sel_ref: (1, g*dim)    f32  1.0 where sin goes, 0.0 where cos goes (resident)
    out_ref: (tn, g*dim)   f32  lane-dense tile -> one unmasked full-width store
    """
    x = x_ref[...]
    w = w_ref[...]
    # Exact broadcast of x[r, k] * freq into lanes [k*dim, (k+1)*dim): w is
    # block-diagonal so every lane has exactly one non-zero product; summing the
    # zero terms is bit-exact.  Pure VPU -- no MXU rounding, no relayout/concat.
    ang = x[:, 0:1] * w[0:1, :]
    for k in range(1, groups):
        ang = ang + x[:, k:k + 1] * w[k:k + 1, :]
    # Exact cos kept (no sin(a + pi/2) fusion -> no |a|*ulp angle error).
    out_ref[...] = jnp.where(sel_ref[...] > 0.5, jnp.sin(ang), jnp.cos(ang))


def _pos_emb_split_kernel(x_ref, freqs_ref, out_ref, *, half_dim):
    """half_dim % 128 == 0: both half stores are already unmasked and lane-dense,
    and each angle gets exactly one sin and one cos evaluation."""
    ang = x_ref[...] * freqs_ref[...]            # (tn, half_dim) broadcast outer
    out_ref[:, :half_dim] = jnp.sin(ang)
    out_ref[:, half_dim:] = jnp.cos(ang)


# ---------------------------------------------------------------------------
# Tiling / VMEM budgets
# ---------------------------------------------------------------------------

def _vmem_budgets():
    """(per-tile output byte budget, vmem_limit_bytes) for this TPU generation."""
    vmem_cap = 64 * _MIB                         # conservative default (v7x per-TC)
    try:
        vmem_cap = int(pltpu.get_tpu_info().vmem_capacity_bytes)
    except Exception:
        pass
    # v5e/v6e (128 MiB physical): limit 64 MiB, 16 MiB output tiles.
    # v7x      (64 MiB physical): limit ~45 MiB, ~11 MiB output tiles.
    vmem_limit = min(int(vmem_cap * 0.7), 64 * _MIB)
    tile_budget = min(vmem_limit // 4, 16 * _MIB)   # 2x double-buffer + headroom
    return tile_budget, vmem_limit


def _choose_tile_rows(total_rows, row_bytes, tile_budget):
    """Rows per output tile: as many as the byte budget allows (multiple of 8),
    but keep >= 2 grid steps so the "parallel" axis can shard over v7x's 2 TCs."""
    if total_rows <= 8:
        return total_rows                        # single full block (allowed)
    budget_rows = max(8, (tile_budget // row_bytes) // 8 * 8)
    half_rows = ((total_rows + 1) // 2 + 7) // 8 * 8
    return max(8, min(budget_rows, half_rows))


# ---------------------------------------------------------------------------
# Wrapper
# ---------------------------------------------------------------------------

def positional_embedding(x, dim, scale=1.0):
    """Pallas equivalent of PositionalEmbedding(dim, scale).forward(x)."""
    assert dim % 2 == 0
    half_dim = dim // 2
    n = x.shape[0]

    x = x.reshape(n).astype(jnp.float32)

    # Frequencies with `scale` folded in (constant-folded in the wrapper; removes
    # one broadcast VPU multiply per tile).  Bit-identical to the reference when
    # scale is 1.0 or a power of two; otherwise within 1 ulp of the angle.
    log_coef = math.log(10000.0) / half_dim
    freqs = jnp.exp(jnp.arange(half_dim, dtype=jnp.float32) * (-log_coef))
    freqs = (freqs * jnp.float32(scale)).astype(jnp.float32)

    tile_budget, vmem_limit = _vmem_budgets()
    compiler_params = pltpu.CompilerParams(
        dimension_semantics=("parallel",),
        vmem_limit_bytes=int(vmem_limit),
    )
    cost = pl.CostEstimate(
        flops=2 * n * dim,
        transcendentals=n * dim,
        bytes_accessed=4 * n * (dim + 1),
    )

    # ---- path 1: half_dim is lane-aligned -> original two-half-store form ----
    if half_dim % 128 == 0:
        x2 = x.reshape(n, 1)
        freqs_row = freqs.reshape(1, half_dim)
        tn = _choose_tile_rows(n, dim * 4, tile_budget)
        grid = (pl.cdiv(n, tn),)                 # ragged final block masked by Pallas
        kernel = functools.partial(_pos_emb_split_kernel, half_dim=half_dim)
        return pl.pallas_call(
            kernel,
            out_shape=jax.ShapeDtypeStruct((n, dim), jnp.float32),
            grid=grid,
            in_specs=[
                pl.BlockSpec((tn, 1), lambda i: (i, 0)),
                pl.BlockSpec((1, half_dim), lambda i: (0, 0)),   # resident
            ],
            out_specs=pl.BlockSpec((tn, dim), lambda i: (i, 0)),
            compiler_params=compiler_params,
            cost_estimate=cost,
        )(x2, freqs_row)

    # ---- path 2: lane-dense packed form --------------------------------------
    g = min(128 // dim, 8) if dim < 128 else 1
    width = g * dim

    # Only when n % g != 0 (<= 7 pad rows) do we pad x (tiny) and slice the output;
    # the lane-density win dominates this rare extra copy.
    n_up = ((n + g - 1) // g) * g
    xp = jnp.pad(x, (0, n_up - n)) if n_up != n else x
    rows = n_up // g
    x2 = xp.reshape(rows, g)

    # Block-diagonal weights: w[k, k*dim + c] = scale * freqs[c % half_dim].
    freqs_dim = jnp.concatenate([freqs, freqs])                        # (dim,)
    w = (jnp.eye(g, dtype=jnp.float32)[:, :, None]
         * freqs_dim[None, None, :]).reshape(g, width)                 # (g, width)
    sel = jnp.tile(
        jnp.concatenate([jnp.ones((half_dim,), jnp.float32),
                         jnp.zeros((half_dim,), jnp.float32)]), g
    ).reshape(1, width)                                                # (1, width)

    tn = _choose_tile_rows(rows, width * 4, tile_budget)
    grid = (pl.cdiv(rows, tn),)                  # ragged final block masked by Pallas
    kernel = functools.partial(_pos_emb_packed_kernel, groups=g)

    out = pl.pallas_call(
        kernel,
        out_shape=jax.ShapeDtypeStruct((rows, width), jnp.float32),
        grid=grid,
        in_specs=[
            pl.BlockSpec((tn, g), lambda i: (i, 0)),
            pl.BlockSpec((g, width), lambda i: (0, 0)),     # resident
            pl.BlockSpec((1, width), lambda i: (0, 0)),     # resident
        ],
        out_specs=pl.BlockSpec((tn, width), lambda i: (i, 0)),
        compiler_params=compiler_params,
        cost_estimate=cost,
    )(x2, w, sel)

    out = out.reshape(n_up, dim)                 # contiguous -> free reshape
    if n_up != n:
        out = out[:n]
    return out


# ---------------------------------------------------------------------------
# Reference + self-test
# ---------------------------------------------------------------------------

def _reference(x, dim, scale=1.0):
    half_dim = dim // 2
    emb = math.log(10000.0) / half_dim
    freqs = jnp.exp(jnp.arange(half_dim, dtype=jnp.float32) * -emb)
    ang = jnp.outer(x.astype(jnp.float32) * scale, freqs)
    return jnp.concatenate((jnp.sin(ang), jnp.cos(ang)), axis=-1)


if __name__ == "__main__":
    key = jax.random.PRNGKey(0)
    k1, k2, k3 = jax.random.split(key, 3)

    # Case 1: diffusion-timestep shape, dim < 128 -> packed lane-dense path
    # (g=4, width=128, single block).
    n1, d1, s1 = 8, 32, 1.0
    x1 = jax.random.uniform(k1, (n1,), jnp.float32, minval=0.0, maxval=1000.0)
    o1 = jax.block_until_ready(positional_embedding(x1, d1, s1))
    assert o1.shape == (n1, d1) and o1.dtype == jnp.float32, (o1.shape, o1.dtype)
    assert jnp.allclose(o1, _reference(x1, d1, s1), atol=1e-5, rtol=1e-5), "case 1 mismatch"

    # Case 2: packed path (g=2) with a multi-step ragged grid and scale != 1.
    n2, d2, s2 = 50, 64, 0.5
    x2 = jax.random.uniform(k2, (n2,), jnp.float32, minval=0.0, maxval=1000.0)
    o2 = jax.block_until_ready(positional_embedding(x2, d2, s2))
    assert o2.shape == (n2, d2), o2.shape
    assert jnp.allclose(o2, _reference(x2, d2, s2), atol=1e-5, rtol=1e-5), "case 2 mismatch"

    # Case 3: half_dim % 128 == 0 -> split (two unmasked half-store) path with a
    # ragged final block (n not a multiple of the row tile).
    n3, d3, s3 = 19, 256, 1.0
    x3 = jax.random.uniform(k3, (n3,), jnp.float32, minval=0.0, maxval=1000.0)
    o3 = jax.block_until_ready(positional_embedding(x3, d3, s3))
    assert o3.shape == (n3, d3), o3.shape
    assert jnp.allclose(o3, _reference(x3, d3, s3), atol=1e-5, rtol=1e-5), "case 3 mismatch"

    print("KERNEL_OK")
</pallas_src>

<mosaic_0001>
module attributes {stable_mosaic.version = 11 : i64} {
  func.func @_pos_emb_packed_kernel(%arg0: i32, %arg1: memref<2x4xf32, #tpu.memory_space<vmem>>, %arg2: memref<4x128xf32, #tpu.memory_space<vmem>>, %arg3: memref<1x128xf32, #tpu.memory_space<vmem>>, %arg4: memref<2x128xf32, #tpu.memory_space<vmem>>) attributes {dimension_semantics = [#tpu.dimension_semantics<parallel>], iteration_bounds = array<i64: 1>, scalar_prefetch = 0 : i64, scratch_operands = 0 : i64, tpu.core_type = #tpu.core_type<tc>, window_params = [{transform_indices = @transform_0, window_bounds = array<i64: 2, 4>}, {pipeline_mode = #tpu.pipeline_mode<synchronous>, transform_indices = @transform_1, window_bounds = array<i64: 4, 128>}, {pipeline_mode = #tpu.pipeline_mode<synchronous>, transform_indices = @transform_2, window_bounds = array<i64: 1, 128>}, {transform_indices = @transform_3, window_bounds = array<i64: 2, 128>}]} {
    %c0 = arith.constant 0 : index
    %c0_0 = arith.constant 0 : index
    %0 = vector.load %arg1[%c0, %c0_0] : memref<2x4xf32, #tpu.memory_space<vmem>>, vector<2x4xf32>
    %c0_1 = arith.constant 0 : index
    %c0_2 = arith.constant 0 : index
    %1 = vector.load %arg2[%c0_1, %c0_2] : memref<4x128xf32, #tpu.memory_space<vmem>>, vector<4x128xf32>
    %2 = vector.extract_strided_slice %0 {offsets = [0, 0], sizes = [2, 1], strides = [1, 1]} : vector<2x4xf32> to vector<2x1xf32>
    %3 = vector.extract_strided_slice %1 {offsets = [0, 0], sizes = [1, 128], strides = [1, 1]} : vector<4x128xf32> to vector<1x128xf32>
    %4 = vector.broadcast %2 : vector<2x1xf32> to vector<2x128xf32>
    %5 = vector.broadcast %3 : vector<1x128xf32> to vector<2x128xf32>
    %6 = arith.mulf %4, %5 : vector<2x128xf32>
    %7 = vector.extract_strided_slice %0 {offsets = [0, 1], sizes = [2, 1], strides = [1, 1]} : vector<2x4xf32> to vector<2x1xf32>
    %8 = vector.extract_strided_slice %1 {offsets = [1, 0], sizes = [1, 128], strides = [1, 1]} : vector<4x128xf32> to vector<1x128xf32>
    %9 = vector.broadcast %7 : vector<2x1xf32> to vector<2x128xf32>
    %10 = vector.broadcast %8 : vector<1x128xf32> to vector<2x128xf32>
    %11 = arith.mulf %9, %10 : vector<2x128xf32>
    %12 = arith.addf %6, %11 : vector<2x128xf32>
    %13 = vector.extract_strided_slice %0 {offsets = [0, 2], sizes = [2, 1], strides = [1, 1]} : vector<2x4xf32> to vector<2x1xf32>
    %14 = vector.extract_strided_slice %1 {offsets = [2, 0], sizes = [1, 128], strides = [1, 1]} : vector<4x128xf32> to vector<1x128xf32>
    %15 = vector.broadcast %13 : vector<2x1xf32> to vector<2x128xf32>
    %16 = vector.broadcast %14 : vector<1x128xf32> to vector<2x128xf32>
    %17 = arith.mulf %15, %16 : vector<2x128xf32>
    %18 = arith.addf %12, %17 : vector<2x128xf32>
    %19 = vector.extract_strided_slice %0 {offsets = [0, 3], sizes = [2, 1], strides = [1, 1]} : vector<2x4xf32> to vector<2x1xf32>
    %20 = vector.extract_strided_slice %1 {offsets = [3, 0], sizes = [1, 128], strides = [1, 1]} : vector<4x128xf32> to vector<1x128xf32>
    %21 = vector.broadcast %19 : vector<2x1xf32> to vector<2x128xf32>
    %22 = vector.broadcast %20 : vector<1x128xf32> to vector<2x128xf32>
    %23 = arith.mulf %21, %22 : vector<2x128xf32>
    %24 = arith.addf %18, %23 : vector<2x128xf32>
    %c0_3 = arith.constant 0 : index
    %c0_4 = arith.constant 0 : index
    %25 = vector.load %arg3[%c0_3, %c0_4] : memref<1x128xf32, #tpu.memory_space<vmem>>, vector<1x128xf32>
    %cst = arith.constant 5.000000e-01 : f32
    %26 = vector.broadcast %cst : f32 to vector<1x128xf32>
    %27 = arith.cmpf ogt, %25, %26 : vector<1x128xf32>
    %28 = math.sin %24 : vector<2x128xf32>
    %29 = math.cos %24 : vector<2x128xf32>
    %30 = vector.shape_cast %27 : vector<1x128xi1> to vector<1x128xi1>
    %31 = vector.broadcast %30 : vector<1x128xi1> to vector<2x128xi1>
    %32 = arith.select %31, %28, %29 : vector<2x128xi1>, vector<2x128xf32>
    %c0_5 = arith.constant 0 : index
    %c0_6 = arith.constant 0 : index
    %33 = vector.load %arg4[%c0_5, %c0_6] : memref<2x128xf32, #tpu.memory_space<vmem>>, vector<2x128xf32>
    tpu.vector_store %arg4[%c0_5, %c0_6], %32 {strides = array<i32>} : memref<2x128xf32, #tpu.memory_space<vmem>>, vector<2x128xf32>,
    return
  }
  func.func @transform_0(%arg0: i32) -> (i32, i32) {
    %c0_i32 = arith.constant 0 : i32
    %c0_i32_0 = arith.constant 0 : i32
    return %arg0, %c0_i32 : i32, i32
  }
  func.func @transform_1(%arg0: i32) -> (i32, i32) {
    %c0_i32 = arith.constant 0 : i32
    %c0_i32_0 = arith.constant 0 : i32
    %c0_i32_1 = arith.constant 0 : i32
    return %c0_i32, %c0_i32_0 : i32, i32
  }
  func.func @transform_2(%arg0: i32) -> (i32, i32) {
    %c0_i32 = arith.constant 0 : i32
    %c0_i32_0 = arith.constant 0 : i32
    %c0_i32_1 = arith.constant 0 : i32
    return %c0_i32, %c0_i32_0 : i32, i32
  }
  func.func @transform_3(%arg0: i32) -> (i32, i32) {
    %c0_i32 = arith.constant 0 : i32
    %c0_i32_0 = arith.constant 0 : i32
    return %arg0, %c0_i32 : i32, i32
  }
}

</mosaic_0001>

<bundles_post_ra>
// kernel: tpu_custom_call.1
= control target key start
LH: loop header
LB: loop body
LE: loop exit
PB: predicated region body
PF: predicated region fallthrough
CT: control target
= control target key end

     0   :  { %8 = vsyncpa [#allocation3], 0  ;;  %s485_s0 = inlined_call_operand.hbm [shape: f32[2,4], index: 0, kind: input, shape index: {}]   ;;  %s486_s1 = inlined_call_operand.hbm [shape: f32[4,128], index: 1, kind: input, shape index: {}]   ;;  %s487_s2 = inlined_call_operand.vmem [shape: f32[1,128], index: 2, kind: input, shape index: {}]   ;;  %s488_s3 = inlined_call_operand.hbm [shape: f32[2,128], index: 3, kind: output, shape index: {}]  }
   0x1   :  { %9 = vsyncpa [#allocation6], 0 }
   0x2   :  { %10 = vsyncpa [#allocation4], 0  ;;  %s414_s12 = smov [#allocation2]   ;;  %s415_s14 = smov [#allocation5]  }
   0x3   :  { %s17_s13 = sshll.u32 %s414_s12, 4  ;;  %s27_s15 = sshll.u32 %s415_s14, 4  ;;  %s18_s13 = int_to_ptr.vmem [resolvable:$true] %s17_s13  ;;  %s28_s15 = int_to_ptr.vmem [resolvable:$true] %s27_s15 }
   0x4   :  { %s356_s16 = scalar_lea.vmem %s18_s13, 32  ;;  %p361_p1 = scmp.lt.s32.totalorder %s18_s13, %s18_s13 }
   0x5   :  { %p357_p0 = scmp.ne.s32.totalorder %s18_s13, %s356_s16  ;;  %p362_p2 = scmp.lt.s32.totalorder %s356_s16, %s356_s16 }
   0x7   :  { %p363_p3 = por %p362_p2, %p361_p1 }
   0x9   :  { %p364_p4 = pnand %p363_p3, %p357_p0 }
   0xb   :  { %367 = shalt.err (!%p364_p4)
}
   0xc   :  { %20 = dma.hbm_to_vmem [thread:$0]  %s485_s0, 32, %s18_s13, [#allocation3]  }
   0xd   :  { %s376_s19 = scalar_lea.vmem %s28_s15, 64  ;;  %p381_p6 = scmp.lt.s32.totalorder %s28_s15, %s28_s15 }
   0xe   :  { %p377_p5 = scmp.ne.s32.totalorder %s28_s15, %s376_s19  ;;  %p382_p7 = scmp.lt.s32.totalorder %s376_s19, %s376_s19 }
  0x10   :  { %p383_p8 = por %p382_p7, %p381_p6 }
  0x12   :  { %p384_p9 = pnand %p383_p8, %p377_p5 }
  0x14   :  { %387 = shalt.err (!%p384_p9)
}
  0x15   :  { %30 = dma.hbm_to_vmem [thread:$0]  %s486_s1, 64, %s28_s15, [#allocation6]  }
  0x16   :  { %408 = dma.done.wait [#allocation3], 32  }
  0x17   :  { %409 = vsyncadd [#allocation3], 4294967264 }
  0x18   :  { %410 = dma.done.wait [#allocation6], 64  }
  0x19   :  { %411 = vsyncadd [#allocation6], 4294967232  ;;  %v46_v0 = vlaneseq  ;;  %v416_v1 = vmov 0   ;;  %v417_v2 = vmov 2   ;;  %v81_v4 = vld [vmem:[%s487_s2] sm:$0x1] }
  0x1a   :  { %339 = vset.pattern.permute.xlu0 %v416_v1  ;;  %341 = vset.pattern.permute.xlu1 %v417_v2  ;;  %v39_v5 = vld [vmem:[#allocation2] sm:$0x3]  ;;  %vm82_vm0 = vcmp.gt.f32.partialorder %v81_v4, 0.5  ;;  %v418_v9 = vmov 1   ;;  %v419_v10 = vmov 3   ;;  %s426_s1 = smov [#allocation7]  }
  0x1b   :  { %v47_v3 = vshrl.u32 %v46_v0, 7  ;;  %43 = vperm.xlu0 %339, %v39_v5   ;;  %62 = vperm.xlu1 %341, %v39_v5   ;;  %v290_v7 = vsel %vm82_vm0, 1, %v416_v1  ;;  %v40_v12 = vld [vmem:[#allocation5] sm:$0xf]  ;;  %v420_v40 = vmov 683565275  }
  0x1c   :  { %v421_v42 = vmov 2475754826   ;;  %v422_v45 = vmov 2131351028   ;;  %v423_v48 = vmov 2102212464  }
  0x1d   :  { %v48_v6 = vsub.s32 0, %v47_v3  ;;  %v57_v11 = vsub.s32 1, %v47_v3  ;;  %v67_v14 = vsub.s32 2, %v47_v3  ;;  %v77_v16 = vsub.s32 3, %v47_v3  ;;  %s304_s2 = sshll.u32 %s426_s1, 4  ;;  %s305_s2 = int_to_ptr.vmem [resolvable:$true] %s304_s2 }
  0x1e   :  { %v424_v51 = vmov 920167782   ;;  %v425_v54 = vmov 1326507024   ;;  %s388_s23 = scalar_lea.vmem %s305_s2, 32  ;;  %p393_p11 = scmp.lt.s32.totalorder %s305_s2, %s305_s2 }
  0x1f   :  { %v456_v8 = vrot.slane %v290_v7, %v48_v6  ;;  %340 = vset.pattern.permute.xlu0 %v418_v9  ;;  %342 = vset.pattern.permute.xlu1 %v419_v10  ;;  %v49_v17 = vrot.slane %v40_v12, %v48_v6  ;;  %v58_v18 = vrot.slane %v40_v12, %v57_v11  ;;  %p389_p10 = scmp.ne.s32.totalorder %s305_s2, %s388_s23  ;;  %p394_p12 = scmp.lt.s32.totalorder %s388_s23, %s388_s23 }
  0x20   :  { %52 = vperm.xlu0 %340, %v39_v5   ;;  %72 = vperm.xlu1 %342, %v39_v5   ;;  %v68_v19 = vrot.slane %v40_v12, %v67_v14  ;;  %v78_v20 = vrot.slane %v40_v12, %v77_v16 }
  0x21   :  { %vm295_vm10 = vcmp.eq.s32.totalorder %v456_v8, 1  ;;  %p395_p13 = por %p394_p12, %p393_p11 }
  0x23   :  { %p396_p0 = pnand %p395_p13, %p389_p10 }
  0x24   :  { %343 = vset.pattern.permute.xlu0 %v419_v10 }
  0x96   :  { %v44_v13 = vpop.permute.xlu0 %43  ;;  %v63_v15 = vpop.permute.xlu1 %62 }
  0x97   :  { %v50_v23 = vmul.f32 %v49_v17, %v44_v13  ;;  %v69_v25 = vmul.f32 %v68_v19, %v63_v15 }
  0x9b   :  { %v53_v21 = vpop.permute.xlu0 %52  ;;  %v73_v22 = vpop.permute.xlu1 %72 }
  0x9c   :  { %v59_v24 = vmul.f32 %v58_v18, %v53_v21  ;;  %v79_v27 = vmul.f32 %v78_v20, %v73_v22 }
  0x9e   :  { %v60_v26 = vadd.f32 %v59_v24, %v50_v23 }
  0xa0   :  { %v70_v28 = vadd.f32 %v69_v25, %v60_v26 }
  0xa2   :  { %v458_v29 = vadd.f32 %v79_v27, %v70_v28 }
  0xa4   :  { %v86_v30 = vand.u32 2139095040, %v458_v29  ;;  %v83_v34 = vand.u32 2147483647, %v458_v29  ;;  %vm85_vm8 = vcmp.lt.s32.totalorder %v458_v29, 0 }
  0xa6   :  { %v87_v31 = vshrl.u32 %v86_v30, 23  ;;  %v90_v37 = vand.u32 8388607, %v83_v34  ;;  %vm84_vm9 = vcmp.le.f32.partialorder %v83_v34, 0.7853982 }
  0xa8   :  { %v314_v32 = vadd.s32 4294967169, %v87_v31  ;;  %v91_v56 = vor.u32 8388608, %v90_v37 }
  0xaa   :  { %v93_v33 = vadd.s32 1, %v314_v32  ;;  %v131_v6 = vshll.u32 %v91_v56, 8 }
  0xac   :  { %vm94_vm1 = vcmp.gt.s32.totalorder %v93_v33, 0 }
  0xad   :  { %v95_v35 = vsel %vm94_vm1, %v93_v33, 0  ;;  %vm175_vm1 = vweird.f32 %v458_v29 }
  0xae   :  { %v97_v36 = vand.u32 31, %v95_v35  ;;  %v96_v39 = vshrl.u32 %v95_v35, 5 }
  0xb0   :  { %v98_v38 = vsub.s32 32, %v97_v36  ;;  %v100_v41 = vshll.u32 %v420_v40, %v97_v36  ;;  %v103_v43 = vshll.u32 %v421_v42, %v97_v36  ;;  %v106_v47 = vshll.u32 %v422_v45, %v97_v36 }
  0xb1   :  { %v109_v50 = vshll.u32 %v423_v48, %v97_v36  ;;  %v112_v53 = vshll.u32 %v424_v51, %v97_v36  ;;  %vm115_vm2 = vcmp.lt.s32.totalorder %v96_v39, 1  ;;  %vm118_vm3 = vcmp.lt.s32.totalorder %v96_v39, 4 }
  0xb2   :  { %v101_v44 = vshrl.u32 %v421_v42, %v98_v38  ;;  %v104_v46 = vshrl.u32 %v422_v45, %v98_v38  ;;  %v107_v49 = vshrl.u32 %v423_v48, %v98_v38  ;;  %v110_v52 = vshrl.u32 %v424_v51, %v98_v38 }
  0xb3   :  { %v113_v55 = vshrl.u32 %v425_v54, %v98_v38  ;;  %v99_v1 = vshrl.u32 %v420_v40, %v98_v38  ;;  %vm117_vm4 = vcmp.lt.s32.totalorder %v96_v39, 3  ;;  %vm116_vm5 = vcmp.lt.s32.totalorder %v96_v39, 2 }
  0xb4   :  { %v102_v57 = vor.u32 %v101_v44, %v100_v41  ;;  %v105_v58 = vor.u32 %v104_v46, %v103_v43  ;;  %v108_v59 = vor.u32 %v107_v49, %v106_v47  ;;  %v111_v60 = vor.u32 %v110_v52, %v109_v50 }
  0xb5   :  { %v114_v61 = vor.u32 %v113_v55, %v112_v53 }
  0xb6   :  { %v120_v62 = vsel %vm118_vm3, %v108_v59, 2102212464  ;;  %v123_v63 = vsel %vm115_vm2, %v102_v57, %v105_v58  ;;  %v127_v0 = vsel %vm115_vm2, %v105_v58, %v108_v59  ;;  %v124_v2 = vsel %vm118_vm3, %v111_v60, 920167782 }
  0xb7   :  { %v128_v3 = vsel %vm118_vm3, %v114_v61, 1326507024  ;;  %v125_v4 = vsel %vm117_vm4, %v108_v59, %v124_v2  ;;  %v119_v7 = vsel %vm115_vm2, %v99_v1, %v102_v57  ;;  %v121_v9 = vsel %vm117_vm4, %v105_v58, %v120_v62 }
  0xb8   :  { %v129_v5 = vsel %vm117_vm4, %v111_v60, %v128_v3  ;;  %v126_v10 = vsel %vm116_vm5, %v123_v63, %v125_v4  ;;  %v122_v16 = vsel %vm116_vm5, %v119_v7, %v121_v9 }
  0xb9   :  { %v130_v11 = vsel %vm116_vm5, %v127_v0, %v129_v5  ;;  %v467_v14 = vmul.u32.u64.low %v131_v6, %v126_v10  ;;  %v468_v15 = vmul.u32.u64.high %v131_v6, %v126_v10, %v467_v14  ;;  %v138_v18 = vmul.u32 %v131_v6, %v122_v16 }
  0xba   :  { %v464_v12 = vmul.u32.u64.low %v131_v6, %v130_v11  ;;  %v465_v13 = vmul.u32.u64.high %v131_v6, %v130_v11, %v464_v12 }
  0xbb   :  { %v141_v17 = vadd.s32 1, %v468_v15 }
  0xbc   :  { %vm140_vm6 = vc.u32 %v465_v13, %v467_v14  ;;  %v139_v31 = vadd.s32 %v467_v14, %v465_v13 }
  0xbd   :  { %v142_v19 = vsel %vm140_vm6, %v141_v17, %v468_v15 }
  0xbe   :  { %v143_v20 = vadd.s32 %v142_v19, %v138_v18 }
  0xc0   :  { %v144_v21 = vadd.s32 536870912, %v143_v20 }
  0xc2   :  { %v145_v22 = vshrl.u32 %v144_v21, 30 }
  0xc4   :  { %v146_v23 = vshll.u32 %v145_v22, 30  ;;  %v169_v45 = vsub.s32 4, %v145_v22 }
  0xc6   :  { %v147_v24 = vsub.s32 %v143_v20, %v146_v23  ;;  %v170_v48 = vsel %vm85_vm8, %v169_v45, %v145_v22 }
  0xc7   :  { %v172_v49 = vsel %vm84_vm9, 0, %v170_v48 }
  0xc8   :  { %v149_v25 = vsub.s32 0, %v147_v24  ;;  %v176_v50 = vadd.s32 3, %v172_v49  ;;  %v280_v52 = vand.u32 3, %v172_v49 }
  0xca   :  { %v315_v26 = vmin.u32 %v149_v25, %v147_v24  ;;  %v177_v51 = vand.u32 3, %v176_v50  ;;  %vm285_vm12 = vcmp.eq.s32.totalorder %v280_v52, 2  ;;  %vm282_vm14 = vcmp.eq.s32.totalorder %v280_v52, 0 }
  0xcb   :  { %vm281_vm0 = vcmp.lt.s32.totalorder %v280_v52, 2 }
  0xcc   :  { %v151_v27 = vclz %v315_v26  ;;  %vm182_vm11 = vcmp.eq.s32.totalorder %v177_v51, 2  ;;  %vm179_vm13 = vcmp.eq.s32.totalorder %v177_v51, 0  ;;  %vm178_vm15 = vcmp.lt.s32.totalorder %v177_v51, 2 }
  0xce   :  { %v316_v28 = vadd.s32 4294967294, %v151_v27 }
  0xd0   :  { %vm317_vm7 = vcmp.lt.s32.totalorder %v316_v28, 0 }
  0xd1   :  { %v154_v30 = vsel %vm317_vm7, 0, %v316_v28 }
  0xd2   :  { %v155_v32 = vsub.s32 32, %v154_v30  ;;  %v159_v33 = vsub.s32 4294967266, %v154_v30  ;;  %v156_v35 = vshll.u32 %v147_v24, %v154_v30 }
  0xd4   :  { %v157_v36 = vshrl.u32 %v139_v31, %v155_v32  ;;  %v160_v37 = vadd.s32 127, %v159_v33 }
  0xd6   :  { %v158_v38 = vor.u32 %v157_v36, %v156_v35  ;;  %v161_v39 = vshll.u32 %v160_v37, 23 }
  0xd8   :  { %v162_v40 = vor.u32 4788187, %v161_v39  ;;  %v165_v42 = vcvt.s32.f32 %v158_v38 }
  0xda   :  { %v163_v41 = vand.u32 2147483647, %v162_v40 }
  0xdc   :  { %v166_v43 = vmul.f32 %v165_v42, %v163_v41 }
  0xde   :  { %v167_v44 = vxor.u32 2147483648, %v166_v43 }
  0xe0   :  { %v168_v46 = vsel %vm85_vm8, %v167_v44, %v166_v43 }
  0xe1   :  { %v171_v47 = vsel %vm84_vm9, %v458_v29, %v168_v46 }
  0xe2   :  { %344 = vcosq.f32 %v171_v47 }
  0xe3   :  { %346 = vsinq.f32 %v171_v47 }
  0xef   :  { %v345_v53 = vpop.eup %344 }
  0xf0   :  { %v347_v54 = vpop.eup %346  ;;  %v183_v55 = vxor.u32 2147483648, %v345_v53 }
  0xf1   :  { %v180_v56 = vxor.u32 2147483648, %v347_v54 }
  0xf2   :  { %v184_v57 = vsel %vm182_vm11, %v183_v55, %v347_v54  ;;  %v287_v34 = vsel %vm285_vm12, %v183_v55, %v347_v54 }
  0xf3   :  { %v181_v58 = vsel %vm179_vm13, %v345_v53, %v180_v56  ;;  %v284_v59 = vsel %vm282_vm14, %v345_v53, %v180_v56 }
  0xf4   :  { %v185_v60 = vsel %vm178_vm15, %v181_v58, %v184_v57  ;;  %v288_v61 = vsel %vm281_vm0, %v284_v59, %v287_v34 }
  0xf5   :  { %v186_v62 = vsel %vm175_vm1, nan, %v185_v60  ;;  %v289_v63 = vsel %vm175_vm1, nan, %v288_v61 }
  0xf6   :  { %v296_v0 = vsel %vm295_vm10, %v186_v62, %v289_v63 }
  0xf7   :  { %297 = vst [vmem:[#allocation7] sm:$0x3] %v296_v0 }
  0xf8   :  { %399 = shalt.err (!%p396_p0)
}
  0xf9   :  { %307 = dma.vmem_to_hbm [thread:$0]  %s305_s2, 32, %s488_s3, [#allocation4]  }
  0xfa   :  { %412 = dma.done.wait [#allocation4], 32  }
  0xfb   :  { %413 = vsyncadd [#allocation4], 4294967264 }
  0xfc   :  { %311 = vsyncpa [#allocation3], 1 }
  0xfd   :  { %312 = vsyncpa [#allocation6], 1 }
  0xfe   :  { %313 = vsyncpa [#allocation4], 1 }

</bundles_post_ra>
